<compile_context>
chip_gen: v5e
topology: v5e:2x2
jax: 0.10.0
libtpu: 0.0.40
codegen_flags: <defaults>
</compile_context>

<pallas_src>
import math

import jax
import jax.numpy as jnp
from jax import lax
from jax.experimental import pallas as pl
from jax.experimental.pallas import tpu as pltpu

C_IN, C_HID, C_OUT, KSIZE = 6, 32, 3, 5
C_IN_PAD = 8       # input channels padded 6 -> 8 (tile-aligned sublane count)
C_OUT_PAD = 8      # output channels padded 3 -> 8 (unmasked full-sublane stores)
DIL = 3            # dilation of the second conv
LANE = 128


def _round_up(v, m):
    return ((v + m - 1) // m) * m


def _make_kernel(T, block, compute_dtype):
    """Kernel closure over static sequence length T, time block size and dtype."""
    L1 = T - (KSIZE - 1)          # conv1 valid output length = T - 4
    Lb = block + 12               # conv1 columns needed per output block (halo)

    def kernel(xw_ref, w1_ref, b1_ref, w2_ref, b2_ref,
               wl_ref, bl_ref, beta_ref, base_ref, o_ref, h1_ref):
        # xw_ref : (1, 8, block+16)  input window; column u maps to x column c0-4+u
        # w1_ref : (32, 40)   conv1 weights (tap-major, channel-minor, zero-padded)
        # w2_ref : (32, 160)  conv2 weights (tap-major, channel-minor)
        # wl_ref : (8, 32)    linear weights, rows 3..7 zero
        # b*/beta/base : (.., 1) per-channel columns (beta pre-scaled by ln 10)
        # o_ref  : (8, block)
        # h1_ref : (32, block+12) VMEM scratch holding (padded) ReLU(conv1)
        c0 = pl.program_id(0) * block
        x_blk = xw_ref[0]                                            # (8, block+16)

        # ---- Conv1d(6->32, k=5): 5-tap matmul accumulation (no im2col buffer) ---
        acc1 = jnp.dot(w1_ref[:, 0:C_IN_PAD], x_blk[:, 0:Lb],
                       preferred_element_type=jnp.float32)
        for k in range(1, KSIZE):
            acc1 += jnp.dot(w1_ref[:, k * C_IN_PAD:(k + 1) * C_IN_PAD],
                            x_blk[:, k:k + Lb],
                            preferred_element_type=jnp.float32)
        acc1 += b1_ref[...]
        h1_ref[...] = jnp.maximum(acc1, 0.0).astype(h1_ref.dtype)   # (32, block+12)

        # ---- ReplicationPad1d(4) around ReLU(conv1): only edge blocks pay -------
        # column u of h1 holds conv1 output for global index g = c0 - 4 + u;
        # columns with g outside [0, L1-1] must take the matching edge value
        # (pad-then-ReLU == ReLU-then-pad since ReLU is pointwise).
        @pl.when(pl.program_id(0) == 0)                  # only block 0 can have g < 0
        def _left_clamp():
            g = lax.broadcasted_iota(jnp.int32, (1, Lb), 1) - 4
            h1 = h1_ref[...]
            h1_ref[...] = jnp.where(g < 0, h1[:, 4:5], h1)   # g==0 lives at u=4

        needs_right = c0 + block + 7 > L1 - 1            # max g in this block > L1-1
        @pl.when(needs_right)                            # at most the last 1-2 blocks
        def _right_clamp():
            g = c0 - 4 + lax.broadcasted_iota(jnp.int32, (1, Lb), 1)
            h1 = h1_ref[...]
            # exactly one column satisfies g == L1-1 whenever needs_right is true
            # (that column index is L1+3-c0 which lies in [8, block+10]).
            right = jnp.sum(jnp.where(g == L1 - 1, h1, jnp.zeros_like(h1)),
                            axis=1, keepdims=True)       # (32, 1)
            h1_ref[...] = jnp.where(g > L1 - 1, right, h1)

        # ---- Conv1d(32->32, k=5, dilation=3): 5-tap matmul accumulation ---------
        acc2 = jnp.dot(w2_ref[:, 0:C_HID], h1_ref[:, 0:block],
                       preferred_element_type=jnp.float32)
        for k in range(1, KSIZE):
            acc2 += jnp.dot(w2_ref[:, k * C_HID:(k + 1) * C_HID],
                            h1_ref[:, DIL * k:DIL * k + block],
                            preferred_element_type=jnp.float32)
        acc2 += b2_ref[...]
        h2 = jnp.maximum(acc2, 0.0).astype(compute_dtype)            # (32, block)

        # ---- Linear(32->3, padded to 8 rows) + Tanh, channels-first -------------
        lin = jnp.tanh(jnp.dot(wl_ref[...], h2,
                               preferred_element_type=jnp.float32) + bl_ref[...])

        # ---- base * 10 ** (beta * lin)   (beta pre-multiplied by ln(10)) --------
        o_ref[...] = base_ref[...] * jnp.exp(beta_ref[...] * lin)

    return kernel


def adaptive_parameter_adjustment(normalized_phone_data, params, block=2048,
                                  compute_dtype=jnp.float32):
    """normalized_phone_data: (T, 6) -> (T, 3) float32 (eval-mode forward)."""
    w1, b1, w2, b2, wl, bl, beta, base = params
    x = jnp.asarray(normalized_phone_data, jnp.float32).T            # (6, T)
    T = int(x.shape[1])
    if T < 9:
        raise ValueError(
            f"sequence length must be >= 9 (got {T}): the dilated conv needs T-8 > 0")

    L2 = T - 8                                                       # conv2 valid length
    block = max(LANE, _round_up(int(block), LANE))
    # Lane-dense block; aim for >= 2 grid steps when there is enough work so the
    # "parallel" time axis can span both v7x TensorCores (harmless on v5e/v6e).
    if L2 >= 2 * LANE:
        B = max(LANE, min(block, _round_up(-(-L2 // 2), LANE)))
    else:
        B = LANE
    nb = -(-L2 // B)
    L2_pad = nb * B

    # ---- input prep: pad channels 6->8, replicate-pad time, overlapping windows ----
    x8 = jnp.concatenate([x, jnp.zeros((C_IN_PAD - C_IN, T), jnp.float32)], axis=0)
    width = L2_pad + 16                                              # covers every window
    xp = jnp.pad(x8, ((0, 0), (4, width - 4 - T)), mode="edge")      # (8, width)
    win = jnp.arange(nb)[:, None] * B + jnp.arange(B + 16)[None, :]  # (nb, B+16)
    xw = jnp.transpose(jnp.take(xp, win, axis=1), (1, 0, 2))         # (nb, 8, B+16)
    xw = xw.astype(compute_dtype)

    # ---- fold weights into matmul form (tap-major, channel-minor) ------------------
    w1_p = jnp.pad(jnp.asarray(w1, jnp.float32), ((0, 0), (0, C_IN_PAD - C_IN), (0, 0)))
    w1_f = jnp.transpose(w1_p, (0, 2, 1)).reshape(C_HID, KSIZE * C_IN_PAD)     # (32, 40)
    w2_f = jnp.transpose(jnp.asarray(w2, jnp.float32), (0, 2, 1)).reshape(
        C_HID, KSIZE * C_HID)                                                   # (32, 160)
    wl_p = jnp.pad(jnp.asarray(wl, jnp.float32), ((0, C_OUT_PAD - C_OUT), (0, 0)))  # (8, 32)
    b1_c = jnp.asarray(b1, jnp.float32).reshape(C_HID, 1)
    b2_c = jnp.asarray(b2, jnp.float32).reshape(C_HID, 1)
    bl_c = jnp.pad(jnp.asarray(bl, jnp.float32), (0, C_OUT_PAD - C_OUT)).reshape(C_OUT_PAD, 1)
    beta_c = jnp.pad(jnp.asarray(beta, jnp.float32) * jnp.float32(math.log(10.0)),
                     (0, C_OUT_PAD - C_OUT)).reshape(C_OUT_PAD, 1)
    base_c = jnp.pad(jnp.asarray(base, jnp.float32), (0, C_OUT_PAD - C_OUT)).reshape(C_OUT_PAD, 1)
    w1_f = w1_f.astype(compute_dtype)
    w2_f = w2_f.astype(compute_dtype)
    wl_p = wl_p.astype(compute_dtype)

    def rep(a):  # weight resident every grid step
        return pl.BlockSpec(a.shape, lambda i, n=a.ndim: (0,) * n)

    flops = 2 * L2_pad * (KSIZE * C_IN_PAD * C_HID + KSIZE * C_HID * C_HID
                          + C_HID * C_OUT_PAD)
    cost = pl.CostEstimate(
        flops=flops,
        transcendentals=2 * C_OUT_PAD * L2_pad,
        bytes_accessed=int(xw.size * xw.dtype.itemsize + C_OUT_PAD * L2_pad * 4
                           + w1_f.size * w1_f.dtype.itemsize
                           + w2_f.size * w2_f.dtype.itemsize))

    out = pl.pallas_call(
        _make_kernel(T, B, compute_dtype),
        out_shape=jax.ShapeDtypeStruct((C_OUT_PAD, L2_pad), jnp.float32),
        grid=(nb,),
        in_specs=[
            pl.BlockSpec((1, C_IN_PAD, B + 16), lambda i: (i, 0, 0)),
            rep(w1_f), rep(b1_c), rep(w2_f), rep(b2_c),
            rep(wl_p), rep(bl_c), rep(beta_c), rep(base_c),
        ],
        out_specs=pl.BlockSpec((C_OUT_PAD, B), lambda i: (0, i)),
        scratch_shapes=[pltpu.VMEM((C_HID, B + 12), compute_dtype)],
        compiler_params=pltpu.CompilerParams(dimension_semantics=("parallel",)),
        cost_estimate=cost,
    )(xw, w1_f, b1_c, w2_f, b2_c, wl_p, bl_c, beta_c, base_c)

    mid = out[:C_OUT, :L2]                              # (3, T-8) valid region
    full = jnp.pad(mid, ((0, 0), (4, 4)), mode="edge")  # final ReplicationPad1d(4) -> (3, T)
    return full.T                                       # (T, 3)


def init_params(key):
    """Deterministic synthetic parameters matching the module's shapes."""
    ks = jax.random.split(key, 6)
    w1 = jax.random.normal(ks[0], (C_HID, C_IN, KSIZE), jnp.float32) * 0.1
    b1 = jax.random.normal(ks[1], (C_HID,), jnp.float32) * 0.1
    w2 = jax.random.normal(ks[2], (C_HID, C_HID, KSIZE), jnp.float32) * 0.05
    b2 = jax.random.normal(ks[3], (C_HID,), jnp.float32) * 0.1
    # cov_lin weight/bias are divided by 100 in __init__
    wl = jax.random.normal(ks[4], (C_OUT, C_HID), jnp.float32) * 0.1 / 100.0
    bl = jax.random.normal(ks[5], (C_OUT,), jnp.float32) * 0.1 / 100.0
    beta = 3.0 * jnp.ones((C_OUT,), jnp.float32)                    # factor_beta
    base = jnp.array([1.0, 5.0, 10.0], jnp.float32)                 # [lat, lon, up]
    return (w1, b1, w2, b2, wl, bl, beta, base)


if __name__ == "__main__":
    T = 16  # sequence length (must be >= 9 so the dilated conv is non-empty)
    key = jax.random.PRNGKey(0)
    k_in, k_par = jax.random.split(key)
    normalized_phone_data = jax.random.normal(k_in, (T, C_IN), jnp.float32)
    params = init_params(k_par)

    out = adaptive_parameter_adjustment(normalized_phone_data, params)
    out = jax.block_until_ready(out)
    assert out.shape == (T, C_OUT) and out.dtype == jnp.float32
    print("KERNEL_OK")
</pallas_src>

<mosaic_0001>
module attributes {stable_mosaic.version = 11 : i64} {
  func.func @kernel(%arg0: i32, %arg1: memref<1x8x144xf32, #tpu.memory_space<vmem>>, %arg2: memref<32x40xf32, #tpu.memory_space<vmem>>, %arg3: memref<32x1xf32, #tpu.memory_space<vmem>>, %arg4: memref<32x160xf32, #tpu.memory_space<vmem>>, %arg5: memref<32x1xf32, #tpu.memory_space<vmem>>, %arg6: memref<8x32xf32, #tpu.memory_space<vmem>>, %arg7: memref<8x1xf32, #tpu.memory_space<vmem>>, %arg8: memref<8x1xf32, #tpu.memory_space<vmem>>, %arg9: memref<8x1xf32, #tpu.memory_space<vmem>>, %arg10: memref<8x128xf32, #tpu.memory_space<vmem>>, %arg11: memref<32x140xf32, #tpu.memory_space<vmem>>) attributes {dimension_semantics = [#tpu.dimension_semantics<parallel>], iteration_bounds = array<i64: 1>, scalar_prefetch = 0 : i64, scratch_operands = 1 : i64, tpu.core_type = #tpu.core_type<tc>, window_params = [{transform_indices = @transform_0, window_bounds = array<i64: 1, 8, 144>}, {pipeline_mode = #tpu.pipeline_mode<synchronous>, transform_indices = @transform_1, window_bounds = array<i64: 32, 40>}, {pipeline_mode = #tpu.pipeline_mode<synchronous>, transform_indices = @transform_2, window_bounds = array<i64: 32, 1>}, {pipeline_mode = #tpu.pipeline_mode<synchronous>, transform_indices = @transform_3, window_bounds = array<i64: 32, 160>}, {pipeline_mode = #tpu.pipeline_mode<synchronous>, transform_indices = @transform_4, window_bounds = array<i64: 32, 1>}, {pipeline_mode = #tpu.pipeline_mode<synchronous>, transform_indices = @transform_5, window_bounds = array<i64: 8, 32>}, {pipeline_mode = #tpu.pipeline_mode<synchronous>, transform_indices = @transform_6, window_bounds = array<i64: 8, 1>}, {pipeline_mode = #tpu.pipeline_mode<synchronous>, transform_indices = @transform_7, window_bounds = array<i64: 8, 1>}, {pipeline_mode = #tpu.pipeline_mode<synchronous>, transform_indices = @transform_8, window_bounds = array<i64: 8, 1>}, {transform_indices = @transform_9, window_bounds = array<i64: 8, 128>}]} {
    %c128_i32 = arith.constant 128 : i32
    %0 = arith.muli %arg0, %c128_i32 : i32
    %c0 = arith.constant 0 : index
    %c0_0 = arith.constant 0 : index
    %c0_1 = arith.constant 0 : index
    %1 = vector.load %arg1[%c0, %c0_0, %c0_1] : memref<1x8x144xf32, #tpu.memory_space<vmem>>, vector<1x8x144xf32>
    %2 = vector.shape_cast %1 : vector<1x8x144xf32> to vector<8x144xf32>
    %c0_2 = arith.constant 0 : index
    %c0_3 = arith.constant 0 : index
    %3 = vector.load %arg2[%c0_2, %c0_3] : memref<32x40xf32, #tpu.memory_space<vmem>>, vector<32x8xf32>
    %4 = vector.extract_strided_slice %2 {offsets = [0, 0], sizes = [8, 140], strides = [1, 1]} : vector<8x144xf32> to vector<8x140xf32>
    %cst = arith.constant dense<0.000000e+00> : vector<32x140xf32>
    %5 = tpu.matmul %3, %4, %cst {dimension_numbers = #tpu.dot_dimension_numbers<[1], [0], [0], [1], [0, 0, 1, 1], [], []>} : vector<32x8xf32>, vector<8x140xf32>, vector<32x140xf32> -> vector<32x140xf32>
    %c0_4 = arith.constant 0 : index
    %c8 = arith.constant 8 : index
    %6 = vector.load %arg2[%c0_4, %c8] : memref<32x40xf32, #tpu.memory_space<vmem>>, vector<32x8xf32>
    %7 = vector.extract_strided_slice %2 {offsets = [0, 1], sizes = [8, 140], strides = [1, 1]} : vector<8x144xf32> to vector<8x140xf32>
    %cst_5 = arith.constant dense<0.000000e+00> : vector<32x140xf32>
    %8 = tpu.matmul %6, %7, %cst_5 {dimension_numbers = #tpu.dot_dimension_numbers<[1], [0], [0], [1], [0, 0, 1, 1], [], []>} : vector<32x8xf32>, vector<8x140xf32>, vector<32x140xf32> -> vector<32x140xf32>
    %9 = arith.addf %5, %8 : vector<32x140xf32>
    %c0_6 = arith.constant 0 : index
    %c16 = arith.constant 16 : index
    %10 = vector.load %arg2[%c0_6, %c16] : memref<32x40xf32, #tpu.memory_space<vmem>>, vector<32x8xf32>
    %11 = vector.extract_strided_slice %2 {offsets = [0, 2], sizes = [8, 140], strides = [1, 1]} : vector<8x144xf32> to vector<8x140xf32>
    %cst_7 = arith.constant dense<0.000000e+00> : vector<32x140xf32>
    %12 = tpu.matmul %10, %11, %cst_7 {dimension_numbers = #tpu.dot_dimension_numbers<[1], [0], [0], [1], [0, 0, 1, 1], [], []>} : vector<32x8xf32>, vector<8x140xf32>, vector<32x140xf32> -> vector<32x140xf32>
    %13 = arith.addf %9, %12 : vector<32x140xf32>
    %c0_8 = arith.constant 0 : index
    %c24 = arith.constant 24 : index
    %14 = vector.load %arg2[%c0_8, %c24] : memref<32x40xf32, #tpu.memory_space<vmem>>, vector<32x8xf32>
    %15 = vector.extract_strided_slice %2 {offsets = [0, 3], sizes = [8, 140], strides = [1, 1]} : vector<8x144xf32> to vector<8x140xf32>
    %cst_9 = arith.constant dense<0.000000e+00> : vector<32x140xf32>
    %16 = tpu.matmul %14, %15, %cst_9 {dimension_numbers = #tpu.dot_dimension_numbers<[1], [0], [0], [1], [0, 0, 1, 1], [], []>} : vector<32x8xf32>, vector<8x140xf32>, vector<32x140xf32> -> vector<32x140xf32>
    %17 = arith.addf %13, %16 : vector<32x140xf32>
    %c0_10 = arith.constant 0 : index
    %c32 = arith.constant 32 : index
    %18 = vector.load %arg2[%c0_10, %c32] : memref<32x40xf32, #tpu.memory_space<vmem>>, vector<32x8xf32>
    %19 = vector.extract_strided_slice %2 {offsets = [0, 4], sizes = [8, 140], strides = [1, 1]} : vector<8x144xf32> to vector<8x140xf32>
    %cst_11 = arith.constant dense<0.000000e+00> : vector<32x140xf32>
    %20 = tpu.matmul %18, %19, %cst_11 {dimension_numbers = #tpu.dot_dimension_numbers<[1], [0], [0], [1], [0, 0, 1, 1], [], []>} : vector<32x8xf32>, vector<8x140xf32>, vector<32x140xf32> -> vector<32x140xf32>
    %21 = arith.addf %17, %20 : vector<32x140xf32>
    %c0_12 = arith.constant 0 : index
    %c0_13 = arith.constant 0 : index
    %22 = vector.load %arg3[%c0_12, %c0_13] : memref<32x1xf32, #tpu.memory_space<vmem>>, vector<32x1xf32>
    %23 = vector.broadcast %22 : vector<32x1xf32> to vector<32x140xf32>
    %24 = arith.addf %21, %23 : vector<32x140xf32>
    %cst_14 = arith.constant 0.000000e+00 : f32
    %25 = vector.broadcast %cst_14 : f32 to vector<32x140xf32>
    %26 = arith.maximumf %24, %25 : vector<32x140xf32>
    %c0_15 = arith.constant 0 : index
    %c0_16 = arith.constant 0 : index
    %27 = vector.load %arg11[%c0_15, %c0_16] : memref<32x140xf32, #tpu.memory_space<vmem>>, vector<32x140xf32>
    tpu.vector_store %arg11[%c0_15, %c0_16], %26 {strides = array<i32>} : memref<32x140xf32, #tpu.memory_space<vmem>>, vector<32x140xf32>,
    %c0_i32 = arith.constant 0 : i32
    %28 = arith.cmpi eq, %arg0, %c0_i32 : i32
    %29 = arith.extui %28 : i1 to i32
    %c0_i32_17 = arith.constant 0 : i32
    %30 = arith.cmpi ne, %29, %c0_i32_17 : i32
    scf.if %30 {
      %74 = tpu.iota {dimensions = array<i32: 1>} : vector<1x140xi32>
      %c4_i32 = arith.constant 4 : i32
      %75 = vector.broadcast %c4_i32 : i32 to vector<1x140xi32>
      %76 = arith.subi %74, %75 : vector<1x140xi32>
      %c0_52 = arith.constant 0 : index
      %c0_53 = arith.constant 0 : index
      %77 = vector.load %arg11[%c0_52, %c0_53] : memref<32x140xf32, #tpu.memory_space<vmem>>, vector<32x140xf32>
      %c0_i32_54 = arith.constant 0 : i32
      %78 = vector.broadcast %c0_i32_54 : i32 to vector<1x140xi32>
      %79 = arith.cmpi slt, %76, %78 : vector<1x140xi32>
      %80 = vector.extract_strided_slice %77 {offsets = [0, 4], sizes = [32, 1], strides = [1, 1]} : vector<32x140xf32> to vector<32x1xf32>
      %81 = vector.shape_cast %79 : vector<1x140xi1> to vector<1x140xi1>
      %82 = vector.broadcast %81 : vector<1x140xi1> to vector<32x140xi1>
      %83 = vector.shape_cast %80 : vector<32x1xf32> to vector<32x1xf32>
      %84 = vector.broadcast %83 : vector<32x1xf32> to vector<32x140xf32>
      %85 = arith.select %82, %84, %77 : vector<32x140xi1>, vector<32x140xf32>
      %c0_55 = arith.constant 0 : index
      %c0_56 = arith.constant 0 : index
      %86 = vector.load %arg11[%c0_55, %c0_56] : memref<32x140xf32, #tpu.memory_space<vmem>>, vector<32x140xf32>
      tpu.vector_store %arg11[%c0_55, %c0_56], %85 {strides = array<i32>} : memref<32x140xf32, #tpu.memory_space<vmem>>, vector<32x140xf32>,
    } else {
    }
    %c128_i32_18 = arith.constant 128 : i32
    %31 = arith.addi %0, %c128_i32_18 : i32
    %c7_i32 = arith.constant 7 : i32
    %32 = arith.addi %31, %c7_i32 : i32
    %c11_i32 = arith.constant 11 : i32
    %33 = arith.cmpi sgt, %32, %c11_i32 : i32
    %34 = arith.extui %33 : i1 to i32
    %c0_i32_19 = arith.constant 0 : i32
    %35 = arith.cmpi ne, %34, %c0_i32_19 : i32
    scf.if %35 {
      %c4_i32 = arith.constant 4 : i32
      %74 = arith.subi %0, %c4_i32 : i32
      %75 = tpu.iota {dimensions = array<i32: 1>} : vector<1x140xi32>
      %76 = vector.broadcast %74 : i32 to vector<1x140xi32>
      %77 = arith.addi %76, %75 : vector<1x140xi32>
      %c0_52 = arith.constant 0 : index
      %c0_53 = arith.constant 0 : index
      %78 = vector.load %arg11[%c0_52, %c0_53] : memref<32x140xf32, #tpu.memory_space<vmem>>, vector<32x140xf32>
      %c11_i32_54 = arith.constant 11 : i32
      %79 = vector.broadcast %c11_i32_54 : i32 to vector<1x140xi32>
      %80 = arith.cmpi eq, %77, %79 : vector<1x140xi32>
      %cst_55 = arith.constant 0.000000e+00 : f32
      %81 = vector.broadcast %cst_55 : f32 to vector<32x140xf32>
      %82 = vector.shape_cast %80 : vector<1x140xi1> to vector<1x140xi1>
      %83 = vector.broadcast %82 : vector<1x140xi1> to vector<32x140xi1>
      %84 = arith.select %83, %78, %81 : vector<32x140xi1>, vector<32x140xf32>
      %cst_56 = arith.constant dense<0.000000e+00> : vector<32xf32>
      %85 = vector.multi_reduction <add>, %84, %cst_56 [1] : vector<32x140xf32> to vector<32xf32>
      %86 = vector.shape_cast %85 : vector<32xf32> to vector<32x1xf32>
      %c11_i32_57 = arith.constant 11 : i32
      %87 = vector.broadcast %c11_i32_57 : i32 to vector<1x140xi32>
      %88 = arith.cmpi sgt, %77, %87 : vector<1x140xi32>
      %89 = vector.shape_cast %88 : vector<1x140xi1> to vector<1x140xi1>
      %90 = vector.broadcast %89 : vector<1x140xi1> to vector<32x140xi1>
      %91 = vector.shape_cast %86 : vector<32x1xf32> to vector<32x1xf32>
      %92 = vector.broadcast %91 : vector<32x1xf32> to vector<32x140xf32>
      %93 = arith.select %90, %92, %78 : vector<32x140xi1>, vector<32x140xf32>
      %c0_58 = arith.constant 0 : index
      %c0_59 = arith.constant 0 : index
      %94 = vector.load %arg11[%c0_58, %c0_59] : memref<32x140xf32, #tpu.memory_space<vmem>>, vector<32x140xf32>
      tpu.vector_store %arg11[%c0_58, %c0_59], %93 {strides = array<i32>} : memref<32x140xf32, #tpu.memory_space<vmem>>, vector<32x140xf32>,
    } else {
    }
    %c0_20 = arith.constant 0 : index
    %c0_21 = arith.constant 0 : index
    %36 = vector.load %arg4[%c0_20, %c0_21] : memref<32x160xf32, #tpu.memory_space<vmem>>, vector<32x32xf32>
    %c0_22 = arith.constant 0 : index
    %c0_23 = arith.constant 0 : index
    %37 = vector.load %arg11[%c0_22, %c0_23] : memref<32x140xf32, #tpu.memory_space<vmem>>, vector<32x128xf32>
    %cst_24 = arith.constant dense<0.000000e+00> : vector<32x128xf32>
    %38 = tpu.matmul %36, %37, %cst_24 {dimension_numbers = #tpu.dot_dimension_numbers<[1], [0], [0], [1], [0, 0, 1, 1], [], []>} : vector<32x32xf32>, vector<32x128xf32>, vector<32x128xf32> -> vector<32x128xf32>
    %c0_25 = arith.constant 0 : index
    %c32_26 = arith.constant 32 : index
    %39 = vector.load %arg4[%c0_25, %c32_26] : memref<32x160xf32, #tpu.memory_space<vmem>>, vector<32x32xf32>
    %c0_27 = arith.constant 0 : index
    %c3 = arith.constant 3 : index
    %40 = vector.load %arg11[%c0_27, %c3] : memref<32x140xf32, #tpu.memory_space<vmem>>, vector<32x128xf32>
    %cst_28 = arith.constant dense<0.000000e+00> : vector<32x128xf32>
    %41 = tpu.matmul %39, %40, %cst_28 {dimension_numbers = #tpu.dot_dimension_numbers<[1], [0], [0], [1], [0, 0, 1, 1], [], []>} : vector<32x32xf32>, vector<32x128xf32>, vector<32x128xf32> -> vector<32x128xf32>
    %42 = arith.addf %38, %41 : vector<32x128xf32>
    %c0_29 = arith.constant 0 : index
    %c64 = arith.constant 64 : index
    %43 = vector.load %arg4[%c0_29, %c64] : memref<32x160xf32, #tpu.memory_space<vmem>>, vector<32x32xf32>
    %c0_30 = arith.constant 0 : index
    %c6 = arith.constant 6 : index
    %44 = vector.load %arg11[%c0_30, %c6] : memref<32x140xf32, #tpu.memory_space<vmem>>, vector<32x128xf32>
    %cst_31 = arith.constant dense<0.000000e+00> : vector<32x128xf32>
    %45 = tpu.matmul %43, %44, %cst_31 {dimension_numbers = #tpu.dot_dimension_numbers<[1], [0], [0], [1], [0, 0, 1, 1], [], []>} : vector<32x32xf32>, vector<32x128xf32>, vector<32x128xf32> -> vector<32x128xf32>
    %46 = arith.addf %42, %45 : vector<32x128xf32>
    %c0_32 = arith.constant 0 : index
    %c96 = arith.constant 96 : index
    %47 = vector.load %arg4[%c0_32, %c96] : memref<32x160xf32, #tpu.memory_space<vmem>>, vector<32x32xf32>
    %c0_33 = arith.constant 0 : index
    %c9 = arith.constant 9 : index
    %48 = vector.load %arg11[%c0_33, %c9] : memref<32x140xf32, #tpu.memory_space<vmem>>, vector<32x128xf32>
    %cst_34 = arith.constant dense<0.000000e+00> : vector<32x128xf32>
    %49 = tpu.matmul %47, %48, %cst_34 {dimension_numbers = #tpu.dot_dimension_numbers<[1], [0], [0], [1], [0, 0, 1, 1], [], []>} : vector<32x32xf32>, vector<32x128xf32>, vector<32x128xf32> -> vector<32x128xf32>
    %50 = arith.addf %46, %49 : vector<32x128xf32>
    %c0_35 = arith.constant 0 : index
    %c128 = arith.constant 128 : index
    %51 = vector.load %arg4[%c0_35, %c128] : memref<32x160xf32, #tpu.memory_space<vmem>>, vector<32x32xf32>
    %c0_36 = arith.constant 0 : index
    %c12 = arith.constant 12 : index
    %52 = vector.load %arg11[%c0_36, %c12] : memref<32x140xf32, #tpu.memory_space<vmem>>, vector<32x128xf32>
    %cst_37 = arith.constant dense<0.000000e+00> : vector<32x128xf32>
    %53 = tpu.matmul %51, %52, %cst_37 {dimension_numbers = #tpu.dot_dimension_numbers<[1], [0], [0], [1], [0, 0, 1, 1], [], []>} : vector<32x32xf32>, vector<32x128xf32>, vector<32x128xf32> -> vector<32x128xf32>
    %54 = arith.addf %50, %53 : vector<32x128xf32>
    %c0_38 = arith.constant 0 : index
    %c0_39 = arith.constant 0 : index
    %55 = vector.load %arg5[%c0_38, %c0_39] : memref<32x1xf32, #tpu.memory_space<vmem>>, vector<32x1xf32>
    %56 = vector.broadcast %55 : vector<32x1xf32> to vector<32x128xf32>
    %57 = arith.addf %54, %56 : vector<32x128xf32>
    %cst_40 = arith.constant 0.000000e+00 : f32
    %58 = vector.broadcast %cst_40 : f32 to vector<32x128xf32>
    %59 = arith.maximumf %57, %58 : vector<32x128xf32>
    %c0_41 = arith.constant 0 : index
    %c0_42 = arith.constant 0 : index
    %60 = vector.load %arg6[%c0_41, %c0_42] : memref<8x32xf32, #tpu.memory_space<vmem>>, vector<8x32xf32>
    %cst_43 = arith.constant dense<0.000000e+00> : vector<8x128xf32>
    %61 = tpu.matmul %60, %59, %cst_43 {dimension_numbers = #tpu.dot_dimension_numbers<[1], [0], [0], [1], [0, 0, 1, 1], [], []>} : vector<8x32xf32>, vector<32x128xf32>, vector<8x128xf32> -> vector<8x128xf32>
    %c0_44 = arith.constant 0 : index
    %c0_45 = arith.constant 0 : index
    %62 = vector.load %arg7[%c0_44, %c0_45] : memref<8x1xf32, #tpu.memory_space<vmem>>, vector<8x1xf32>
    %63 = vector.broadcast %62 : vector<8x1xf32> to vector<8x128xf32>
    %64 = arith.addf %61, %63 : vector<8x128xf32>
    %65 = math.tanh %64 : vector<8x128xf32>
    %c0_46 = arith.constant 0 : index
    %c0_47 = arith.constant 0 : index
    %66 = vector.load %arg9[%c0_46, %c0_47] : memref<8x1xf32, #tpu.memory_space<vmem>>, vector<8x1xf32>
    %c0_48 = arith.constant 0 : index
    %c0_49 = arith.constant 0 : index
    %67 = vector.load %arg8[%c0_48, %c0_49] : memref<8x1xf32, #tpu.memory_space<vmem>>, vector<8x1xf32>
    %68 = vector.broadcast %67 : vector<8x1xf32> to vector<8x128xf32>
    %69 = arith.mulf %68, %65 : vector<8x128xf32>
    %70 = math.exp %69 : vector<8x128xf32>
    %71 = vector.broadcast %66 : vector<8x1xf32> to vector<8x128xf32>
    %72 = arith.mulf %71, %70 : vector<8x128xf32>
    %c0_50 = arith.constant 0 : index
    %c0_51 = arith.constant 0 : index
    %73 = vector.load %arg10[%c0_50, %c0_51] : memref<8x128xf32, #tpu.memory_space<vmem>>, vector<8x128xf32>
    tpu.vector_store %arg10[%c0_50, %c0_51], %72 {strides = array<i32>} : memref<8x128xf32, #tpu.memory_space<vmem>>, vector<8x128xf32>,
    return
  }
  func.func @transform_0(%arg0: i32) -> (i32, i32, i32) {
    %c0_i32 = arith.constant 0 : i32
    %c0_i32_0 = arith.constant 0 : i32
    %c0_i32_1 = arith.constant 0 : i32
    return %arg0, %c0_i32, %c0_i32_0 : i32, i32, i32
  }
  func.func @transform_1(%arg0: i32) -> (i32, i32) {
    %c0_i32 = arith.constant 0 : i32
    %c0_i32_0 = arith.constant 0 : i32
    %c0_i32_1 = arith.constant 0 : i32
    return %c0_i32, %c0_i32_0 : i32, i32
  }
  func.func @transform_2(%arg0: i32) -> (i32, i32) {
    %c0_i32 = arith.constant 0 : i32
    %c0_i32_0 = arith.constant 0 : i32
    %c0_i32_1 = arith.constant 0 : i32
    return %c0_i32, %c0_i32_0 : i32, i32
  }
  func.func @transform_3(%arg0: i32) -> (i32, i32) {
    %c0_i32 = arith.constant 0 : i32
    %c0_i32_0 = arith.constant 0 : i32
    %c0_i32_1 = arith.constant 0 : i32
    return %c0_i32, %c0_i32_0 : i32, i32
  }
  func.func @transform_4(%arg0: i32) -> (i32, i32) {
    %c0_i32 = arith.constant 0 : i32
    %c0_i32_0 = arith.constant 0 : i32
    %c0_i32_1 = arith.constant 0 : i32
    return %c0_i32, %c0_i32_0 : i32, i32
  }
  func.func @transform_5(%arg0: i32) -> (i32, i32) {
    %c0_i32 = arith.constant 0 : i32
    %c0_i32_0 = arith.constant 0 : i32
    %c0_i32_1 = arith.constant 0 : i32
    return %c0_i32, %c0_i32_0 : i32, i32
  }
  func.func @transform_6(%arg0: i32) -> (i32, i32) {
    %c0_i32 = arith.constant 0 : i32
    %c0_i32_0 = arith.constant 0 : i32
    %c0_i32_1 = arith.constant 0 : i32
    return %c0_i32, %c0_i32_0 : i32, i32
  }
  func.func @transform_7(%arg0: i32) -> (i32, i32) {
    %c0_i32 = arith.constant 0 : i32
    %c0_i32_0 = arith.constant 0 : i32
    %c0_i32_1 = arith.constant 0 : i32
    return %c0_i32, %c0_i32_0 : i32, i32
  }
  func.func @transform_8(%arg0: i32) -> (i32, i32) {
    %c0_i32 = arith.constant 0 : i32
    %c0_i32_0 = arith.constant 0 : i32
    %c0_i32_1 = arith.constant 0 : i32
    return %c0_i32, %c0_i32_0 : i32, i32
  }
  func.func @transform_9(%arg0: i32) -> (i32, i32) {
    %c0_i32 = arith.constant 0 : i32
    %c0_i32_0 = arith.constant 0 : i32
    return %c0_i32, %arg0 : i32, i32
  }
}

</mosaic_0001>

<bundles_post_ra>
// kernel: tpu_custom_call.1
= control target key start
LH: loop header
LB: loop body
LE: loop exit
PB: predicated region body
PF: predicated region fallthrough
CT: control target
= control target key end

     0   :  { %14 = vsyncpa [#allocation4], 0  ;;  %s1678_s0 = inlined_call_operand.vmem [shape: f32[1,8,144], index: 0, kind: input, shape index: {}]   ;;  %s1679_s1 = inlined_call_operand.hbm [shape: f32[32,40], index: 1, kind: input, shape index: {}]   ;;  %s1680_s2 = inlined_call_operand.vmem [shape: f32[32,1], index: 2, kind: input, shape index: {}]   ;;  %s1681_s3 = inlined_call_operand.vmem [shape: f32[32,160], index: 3, kind: input, shape index: {}]   ;;  %s1682_s4 = inlined_call_operand.vmem [shape: f32[32,1], index: 4, kind: input, shape index: {}]   ;;  %s1683_s5 = inlined_call_operand.vmem [shape: f32[8,32], index: 5, kind: input, shape index: {}]   ;;  %s1684_s6 = inlined_call_operand.vmem [shape: f32[8,1], index: 6, kind: input, shape index: {}]   ;;  %s1685_s7 = inlined_call_operand.vmem [shape: f32[8,1], index: 7, kind: input, shape index: {}]   ;;  %s1686_s8 = inlined_call_operand.vmem [shape: f32[8,1], index: 8, kind: input, shape index: {}]   ;;  %s1687_s9 = inlined_call_operand.hbm [shape: f32[8,128], index: 9, kind: output, shape index: {}]  }
   0x1   :  { %15 = vsyncpa [#allocation5], 0  ;;  %s22_s11 = sshll.u32 %s1679_s1, 4  ;;  %s1358_s12 = smov [#allocation3]   ;;  %s23_s11 = int_to_ptr.hbm [resolvable:$true] %s22_s11 }
   0x2   :  { %s24_s13 = sshll.u32 %s1358_s12, 4  ;;  %s1359_s14 = smov 128   ;;  %s25_s13 = int_to_ptr.vmem [resolvable:$true] %s24_s13 }
   0x3   :  { %s1360_s15 = smov 8  }
   0x4   :  { %30 = dma.hbm_to_vmem [thread:$0]  %s23_s11, 512, %s25_s13, [#allocation4], %s1359_s14, %s1359_s14, %s1360_s15  }
   0x5   :  { %1354 = dma.done.wait [#allocation4], 512  }
   0x6   :  { %1355 = vsyncadd [#allocation4], 4294966784  ;;  %v50_v0 = vld [vmem:[%s1678_s0] sm:$0xff]  ;;  %v51_v1 = vld [vmem:[%s1678_s0 + $0x8] sm:$0xff]  ;;  %s1361_s1 = smov 120   ;;  %s1362_s20 = smov 127  }
   0x7   :  { %v1193_v2 = vpack.i.bf16 %v51_v1, %v50_v0  ;;  %v53_v3 = vld [vmem:[#allocation3 + $0x8] sm:$0xff]  ;;  %v55_v4 = vld [vmem:[#allocation3 + $0x18] sm:$0xff]  ;;  %168 = vmatpush.msra.mxu2 %v50_v0  ;;  %197 = vmatpush.msra.mxu3 %v51_v1  ;;  %v54_v5 = vld [vmem:[#allocation3 + $0x10] sm:$0xff]  ;;  %s1363_s21 = smov 126   ;;  %s1364_s22 = smov 112   ;;  %vm78_vm0 = vcmask 64512  }
   0x8   :  { %62 = vrot.lane.b32.xlu1 %v53_v3, %s1361_s1  ;;  %66 = vrot.lane.b32.xlu2 %v55_v4, %s1361_s1  ;;  %v52_v6 = vld [vmem:[#allocation3] sm:$0xff]  ;;  %s1365_s0 = smov 104   ;;  %s1366_s23 = smov 125   ;;  %vm74_vm1 = vcmask 1039360   ;;  %vm223_vm2 = vcmask 1031168   ;;  %vm313_vm3 = vcmask 1022976  }
   0x9   :  { %1194 = vrot.lane.b32.xlu0 %v1193_v2, %s1362_s20  ;;  %s1367_s24 = smov 96   ;;  %s1368_s25 = smov 124   ;;  %1119 = vmatmul.msk.f32.vlgmr.msra.gmra.mxu2 %vm78_vm0, %v52_v6  ;;  %vm403_vm4 = vcmask 1014784   ;;  %v482_v36 = vld [vmem:[%s1680_s2 + $0x8] sm:$0xff]  ;;  %v1369_v37 = vmov 0   ;;  %v484_v38 = vld [vmem:[%s1680_s2 + $0x18] sm:$0xff] }
   0xa   :  { %1123 = vmatmul.msk.f32.vlgmr.msra.gmra.mxu3 %vm78_vm0, %v52_v6  ;;  %1215 = vset.pattern.permute.xlu1 %v1369_v37  ;;  %v483_v39 = vld [vmem:[%s1680_s2 + $0x10] sm:$0xff]  ;;  %v481_v40 = vld [vmem:[%s1680_s2] sm:$0xff]  ;;  %v1370_v0 = vmov 4   ;;  %vm522_vm5 = vcmask 97280   ;;  %s1371_s18 = smov 116   ;;  %s1372_s19 = smov 122  }
   0xb   :  { %1214 = vset.pattern.permute.xlu0 %v1369_v37  ;;  %1213 = vset.pattern.permute.xlu2 %v1369_v37  ;;  %vm717_vm9 = vcmask 261120   ;;  %vm960_vm10 = vcmask 949248   ;;  %vm816_vm11 = vcmask 998400   ;;  %vm890_vm12 = vcmask 973824  }
  0x10   :  { %64 = vrot.lane.b32.xlu1 %v54_v5, %s1361_s1  ;;  %1199 = vrot.lane.b32.xlu2 %v1193_v2, %s1363_s21 }
  0x11   :  { %60 = vrot.lane.b32.xlu0 %v52_v6, %s1361_s1  ;;  %1120 = vmatmul.msk.f32.gmra.mxu2 %vm78_vm0, %v53_v3  ;;  %s1373_s1 = smov 64  }
  0x12   :  { %1124 = vmatmul.msk.f32.gmra.mxu3 %vm78_vm0, %v53_v3 }
  0x18   :  { %213 = vrot.lane.b32.xlu1 %v53_v3, %s1364_s22  ;;  %215 = vrot.lane.b32.xlu2 %v54_v5, %s1364_s22 }
  0x19   :  { %211 = vrot.lane.b32.xlu0 %v52_v6, %s1364_s22  ;;  %1121 = vmatmul.msk.f32.gmra.mxu2 %vm78_vm0, %v54_v5 }
  0x1a   :  { %1125 = vmatmul.msk.f32.gmra.mxu3 %vm78_vm0, %v54_v5 }
  0x20   :  { %217 = vrot.lane.b32.xlu1 %v55_v4, %s1364_s22  ;;  %301 = vrot.lane.b32.xlu2 %v52_v6, %s1365_s0  ;;  %s1374_s22 = smov 119  }
  0x21   :  { %1204 = vrot.lane.b32.xlu0 %v1193_v2, %s1366_s23  ;;  %1122 = vmatmul.msk.f32.gmra.mxu2 %vm78_vm0, %v55_v4 }
  0x22   :  { %1126 = vmatmul.msk.f32.gmra.mxu3 %vm78_vm0, %v55_v4 }
  0x28   :  { %303 = vrot.lane.b32.xlu1 %v53_v3, %s1365_s0  ;;  %391 = vrot.lane.b32.xlu2 %v52_v6, %s1367_s24 }
  0x29   :  { %1209 = vrot.lane.b32.xlu0 %v1193_v2, %s1368_s25 }
  0x30   :  { %393 = vrot.lane.b32.xlu1 %v53_v3, %s1367_s24  ;;  %307 = vrot.lane.b32.xlu2 %v55_v4, %s1365_s0 }
  0x31   :  { %305 = vrot.lane.b32.xlu0 %v54_v5, %s1365_s0  ;;  %s1375_s0 = smov 32  }
  0x38   :  { %397 = vrot.lane.b32.xlu1 %v55_v4, %s1367_s24  ;;  %502 = vperm.xlu2 %1213, %v484_v38  }
  0x39   :  { %395 = vrot.lane.b32.xlu0 %v54_v5, %s1367_s24 }
  0x40   :  { %492 = vperm.xlu1 %1215, %v482_v36   ;;  %487 = vperm.xlu2 %1213, %v481_v40  }
  0x41   :  { %497 = vperm.xlu0 %1214, %v483_v39  }
  0x48   :  { %1216 = vset.pattern.permute.xlu2 %v1370_v0  ;;  %1218 = vset.pattern.permute.xlu1 %v1370_v0 }
  0x49   :  { %1217 = vset.pattern.permute.xlu0 %v1370_v0 }
  0x62   :  { %v67_v7 = vpop.permute.xlu2 %66 }
  0x6a   :  { %v1200_v8 = vpop.permute.xlu2 %1199 }
  0x6b   :  { %v1201_v10 = vunpack.i.l.bf16 %v1200_v8  ;;  %v1202_v14 = vunpack.i.h.bf16 %v1200_v8 }
  0x6d   :  { %v224_v16 = vsel %vm223_vm2, %v1201_v10, %v1202_v14 }
  0x72   :  { %v216_v20 = vpop.permute.xlu2 %215 }
  0x7a   :  { %v63_v9 = vpop.permute.xlu1 %62  ;;  %v302_v26 = vpop.permute.xlu2 %301 }
  0x7b   :  { %v1195_v11 = vpop.permute.xlu0 %1194 }
  0x7c   :  { %v1196_v12 = vunpack.i.l.bf16 %v1195_v11  ;;  %v1197_v13 = vunpack.i.h.bf16 %v1195_v11 }
  0x7e   :  { %131 = vmatpush.msra.mxu1 %v1197_v13  ;;  %v75_v15 = vsel %vm74_vm1, %v1196_v12, %v1197_v13 }
  0x7f   :  { %102 = vmatpush.msra.mxu0 %v75_v15 }
  0x80   :  { %279 = vmatpush.msrb.mxu1 %v1202_v14 }
  0x81   :  { %250 = vmatpush.msrb.mxu0 %v224_v16 }
  0x82   :  { %v65_v17 = vpop.permute.xlu1 %64  ;;  %v392_v33 = vpop.permute.xlu2 %391 }
  0x83   :  { %v61_v18 = vpop.permute.xlu0 %60 }
  0x84   :  { %1111 = vmatmul.msk.f32.vlgmr.msra.gmra.mxu0 %vm78_vm0, %v61_v18  ;;  %1115 = vmatmul.msk.f32.vlgmr.msra.gmra.mxu1 %vm78_vm0, %v61_v18 }
  0x8a   :  { %v214_v19 = vpop.permute.xlu1 %213  ;;  %v308_v35 = vpop.permute.xlu2 %307 }
  0x8b   :  { %v212_v21 = vpop.permute.xlu0 %211 }
  0x8c   :  { %1112 = vmatmul.msk.f32.gmra.mxu0 %vm78_vm0, %v63_v9  ;;  %1116 = vmatmul.msk.f32.gmra.mxu1 %vm78_vm0, %v63_v9  ;;  %v1499_v49 = vpop.f32.mrf.mxu2 }
  0x8d   :  { %v199_v48 = vpop.f32.mrf.mxu3 }
  0x92   :  { %v218_v22 = vpop.permute.xlu1 %217  ;;  %v1509_v5 = vpop.permute.xlu2 %502 }
  0x93   :  { %v1205_v23 = vpop.permute.xlu0 %1204 }
  0x94   :  { %1113 = vmatmul.msk.f32.gmra.mxu0 %vm78_vm0, %v65_v17  ;;  %1117 = vmatmul.msk.f32.gmra.mxu1 %vm78_vm0, %v65_v17  ;;  %v1207_v24 = vunpack.i.h.bf16 %v1205_v23  ;;  %v1206_v25 = vunpack.i.l.bf16 %v1205_v23  ;;  %v173_v55 = vpop.f32.mrf.mxu2 }
  0x95   :  { %v202_v52 = vpop.f32.mrf.mxu3 }
  0x96   :  { %v314_v27 = vsel %vm313_vm3, %v1206_v25, %v1207_v24  ;;  %369 = vmatpush.msrb.mxu3 %v1207_v24 }
  0x97   :  { %340 = vmatpush.msrb.mxu2 %v314_v27  ;;  %1139 = vmatmul.msk.f32.vlgmr.msrb.gmra.mxu3 %vm78_vm0, %v302_v26 }
  0x98   :  { %1135 = vmatmul.msk.f32.vlgmr.msrb.gmra.mxu2 %vm78_vm0, %v302_v26 }
  0x9a   :  { %v304_v29 = vpop.permute.xlu1 %303  ;;  %v1511_v13 = vpop.permute.xlu2 %487 }
  0x9b   :  { %v1210_v28 = vpop.permute.xlu0 %1209 }
  0x9c   :  { %1114 = vmatmul.msk.f32.gmra.mxu0 %vm78_vm0, %v67_v7  ;;  %1118 = vmatmul.msk.f32.gmra.mxu1 %vm78_vm0, %v67_v7  ;;  %v1212_v30 = vunpack.i.h.bf16 %v1210_v28  ;;  %v1211_v31 = vunpack.i.l.bf16 %v1210_v28  ;;  %v176_v59 = vpop.f32.mrf.mxu2 }
  0x9d   :  { %v205_v58 = vpop.f32.mrf.mxu3 }
  0x9e   :  { %459 = vmatpush.msra.mxu1 %v1212_v30  ;;  %v404_v32 = vsel %vm403_vm4, %v1211_v31, %v1212_v30 }
  0x9f   :  { %1140 = vmatmul.msk.f32.gmra.mxu3 %vm78_vm0, %v304_v29  ;;  %430 = vmatpush.msra.mxu0 %v404_v32 }
  0xa0   :  { %1136 = vmatmul.msk.f32.gmra.mxu2 %vm78_vm0, %v304_v29 }
  0xa2   :  { %v394_v41 = vpop.permute.xlu1 %393 }
  0xa3   :  { %v306_v34 = vpop.permute.xlu0 %305 }
  0xa4   :  { %1127 = vmatmul.msk.f32.vlgmr.msrb.gmra.mxu0 %vm78_vm0, %v212_v21  ;;  %1131 = vmatmul.msk.f32.vlgmr.msrb.gmra.mxu1 %vm78_vm0, %v212_v21  ;;  %v179_v63 = vpop.f32.mrf.mxu2 }
  0xa5   :  { %v208_v62 = vpop.f32.mrf.mxu3 }
  0xa7   :  { %1141 = vmatmul.msk.f32.gmra.mxu3 %vm78_vm0, %v306_v34 }
  0xa8   :  { %1137 = vmatmul.msk.f32.gmra.mxu2 %vm78_vm0, %v306_v34 }
  0xaa   :  { %v398_v43 = vpop.permute.xlu1 %397 }
  0xab   :  { %v396_v42 = vpop.permute.xlu0 %395 }
  0xac   :  { %1128 = vmatmul.msk.f32.gmra.mxu0 %vm78_vm0, %v214_v19  ;;  %1132 = vmatmul.msk.f32.gmra.mxu1 %vm78_vm0, %v214_v19 }
  0xaf   :  { %1142 = vmatmul.msk.f32.gmra.mxu3 %vm78_vm0, %v308_v35 }
  0xb0   :  { %1138 = vmatmul.msk.f32.gmra.mxu2 %vm78_vm0, %v308_v35 }
  0xb2   :  { %v493_v25 = vpop.permute.xlu1 %492 }
  0xb4   :  { %1129 = vmatmul.msk.f32.gmra.mxu0 %vm78_vm0, %v216_v20  ;;  %1133 = vmatmul.msk.f32.gmra.mxu1 %vm78_vm0, %v216_v20 }
  0xbc   :  { %1130 = vmatmul.msk.f32.gmra.mxu0 %vm78_vm0, %v218_v22  ;;  %1134 = vmatmul.msk.f32.gmra.mxu1 %vm78_vm0, %v218_v22 }
  0xc4   :  { %1143 = vmatmul.msk.f32.vlgmr.msra.gmra.mxu0 %vm78_vm0, %v392_v33  ;;  %1147 = vmatmul.msk.f32.vlgmr.msra.gmra.mxu1 %vm78_vm0, %v392_v33 }
  0xcc   :  { %1144 = vmatmul.msk.f32.gmra.mxu0 %vm78_vm0, %v394_v41  ;;  %1148 = vmatmul.msk.f32.gmra.mxu1 %vm78_vm0, %v394_v41 }
  0xd4   :  { %1145 = vmatmul.msk.f32.gmra.mxu0 %vm78_vm0, %v396_v42  ;;  %1149 = vmatmul.msk.f32.gmra.mxu1 %vm78_vm0, %v396_v42 }
  0xdc   :  { %1146 = vmatmul.msk.f32.gmra.mxu0 %vm78_vm0, %v398_v43  ;;  %1150 = vmatmul.msk.f32.gmra.mxu1 %vm78_vm0, %v398_v43 }
 0x101   :  { %v1497_v44 = vpop.f32.mrf.mxu0  ;;  %v133_v45 = vpop.f32.mrf.mxu1 }
 0x102   :  { %v200_v8 = vadd.f32 %v199_v48, %v133_v45  ;;  %v498_v45 = vpop.permute.xlu0 %497  ;;  %v171_v0 = vadd.f32 %v1499_v49, %v1497_v44 }
 0x109   :  { %v107_v46 = vpop.f32.mrf.mxu0  ;;  %v136_v47 = vpop.f32.mrf.mxu1 }
 0x10a   :  { %v174_v16 = vadd.f32 %v173_v55, %v107_v46  ;;  %v203_v17 = vadd.f32 %v202_v52, %v136_v47 }
 0x111   :  { %v110_v50 = vpop.f32.mrf.mxu0  ;;  %v139_v51 = vpop.f32.mrf.mxu1 }
 0x112   :  { %v177_v28 = vadd.f32 %v176_v59, %v110_v50  ;;  %v206_v29 = vadd.f32 %v205_v58, %v139_v51 }
 0x119   :  { %v1501_v53 = vpop.f32.mrf.mxu0  ;;  %v1503_v54 = vpop.f32.mrf.mxu1 }
 0x11a   :  { %v371_v3 = vpop.f32.mrf.mxu3  ;;  %v180_v48 = vadd.f32 %v179_v63, %v1501_v53  ;;  %v209_v50 = vadd.f32 %v208_v62, %v1503_v54 }
 0x11b   :  { %v1507_v4 = vpop.f32.mrf.mxu2 }
 0x121   :  { %v1505_v56 = vpop.f32.mrf.mxu0  ;;  %v281_v57 = vpop.f32.mrf.mxu1 }
 0x122   :  { %v294_v9 = vadd.f32 %v281_v57, %v200_v8  ;;  %v374_v10 = vpop.f32.mrf.mxu3  ;;  %v293_v8 = vadd.f32 %v1505_v56, %v171_v0 }
 0x123   :  { %v345_v12 = vpop.f32.mrf.mxu2 }
 0x124   :  { %v384_v11 = vadd.f32 %v371_v3, %v294_v9  ;;  %v383_v44 = vadd.f32 %v1507_v4, %v293_v8 }
 0x129   :  { %v255_v60 = vpop.f32.mrf.mxu0  ;;  %v284_v61 = vpop.f32.mrf.mxu1 }
 0x12a   :  { %v295_v19 = vadd.f32 %v255_v60, %v174_v16  ;;  %v296_v20 = vadd.f32 %v284_v61, %v203_v17  ;;  %v377_v33 = vpop.f32.mrf.mxu3 }
 0x12b   :  { %v348_v32 = vpop.f32.mrf.mxu2 }
 0x12c   :  { %v385_v23 = vadd.f32 %v345_v12, %v295_v19  ;;  %v386_v24 = vadd.f32 %v374_v10, %v296_v20 }
 0x131   :  { %v258_v1 = vpop.f32.mrf.mxu0  ;;  %v287_v2 = vpop.f32.mrf.mxu1 }
 0x132   :  { %v297_v34 = vadd.f32 %v258_v1, %v177_v28  ;;  %v298_v35 = vadd.f32 %v287_v2, %v206_v29  ;;  %v380_v61 = vpop.f32.mrf.mxu3  ;;  %v1547_v28 = vld [vmem:[%s1681_s3] sm:$0xff]  ;;  %v1554_v29 = vld [vmem:[%s1681_s3 + $0x10] sm:$0xff] }
 0x133   :  { %v351_v60 = vpop.f32.mrf.mxu2 }
 0x134   :  { %v387_v42 = vadd.f32 %v348_v32, %v297_v34  ;;  %v388_v43 = vadd.f32 %v377_v33, %v298_v35  ;;  %v1564_v35 = vld [vmem:[%s1681_s3 + $0x30] sm:$0xff] }
 0x139   :  { %v261_v6 = vpop.f32.mrf.mxu0  ;;  %v290_v7 = vpop.f32.mrf.mxu1 }
 0x13a   :  { %v299_v55 = vadd.f32 %v261_v6, %v180_v48  ;;  %v300_v57 = vadd.f32 %v290_v7, %v209_v50  ;;  %v663_v50 = vld [vmem:[%s1681_s3 + $0x20] sm:$0xff] }
 0x13c   :  { %v389_v9 = vadd.f32 %v351_v60, %v299_v55  ;;  %v390_v53 = vadd.f32 %v380_v61, %v300_v57 }
 0x141   :  { %v1513_v14 = vpop.f32.mrf.mxu0  ;;  %v461_v15 = vpop.f32.mrf.mxu1 }
 0x142   :  { %v474_v18 = vadd.f32 %v461_v15, %v384_v11  ;;  %v473_v56 = vadd.f32 %v1513_v14, %v383_v44 }
 0x144   :  { %v506_v21 = vadd.f32 %v1511_v13, %v474_v18  ;;  %v505_v15 = vadd.f32 %v1511_v13, %v473_v56 }
 0x146   :  { %v514_v22 = vmax.f32 %v506_v21, 0.0  ;;  %v513_v16 = vmax.f32 %v505_v15, 0.0 }
 0x148   :  { %523 = vst.msk [vmem:[#allocation2 + $0x8] sm:$0xff] %vm522_vm5, %v514_v22 }
 0x149   :  { %v435_v26 = vpop.f32.mrf.mxu0  ;;  %v464_v27 = vpop.f32.mrf.mxu1 }
 0x14a   :  { %v475_v30 = vadd.f32 %v435_v26, %v385_v23  ;;  %v476_v31 = vadd.f32 %v464_v27, %v386_v24 }
 0x14c   :  { %v1517_v36 = vadd.f32 %v493_v25, %v475_v30  ;;  %v508_v38 = vadd.f32 %v493_v25, %v476_v31 }
 0x14e   :  { %v515_v39 = vmax.f32 %v1517_v36, 0.0  ;;  %v516_v40 = vmax.f32 %v508_v38, 0.0 }
 0x14f   :  { %v540_v41 = vld [vmem:[#allocation2 + $0x8] sm:$0xff] }
 0x150   :  { %525 = vst.msk [vmem:[#allocation2 + $0x18] sm:$0xff] %vm522_vm5, %v516_v40  ;;  %560 = vperm.xlu0 %1217, %v515_v39  }
 0x151   :  { %v438_v46 = vpop.f32.mrf.mxu0  ;;  %v467_v47 = vpop.f32.mrf.mxu1  ;;  %582 = vst.msk [vmem:[#allocation2 + $0x8] sm:$0xff] %vm522_vm5, %v540_v41 }
 0x152   :  { %v477_v51 = vadd.f32 %v438_v46, %v387_v42  ;;  %v478_v52 = vadd.f32 %v467_v47, %v388_v43 }
 0x154   :  { %v509_v58 = vadd.f32 %v498_v45, %v477_v51  ;;  %v510_v59 = vadd.f32 %v498_v45, %v478_v52 }
 0x156   :  { %v517_v1 = vmax.f32 %v509_v58, 0.0  ;;  %v518_v2 = vmax.f32 %v510_v59, 0.0 }
 0x157   :  { %v542_v3 = vld [vmem:[#allocation2 + $0x18] sm:$0xff] }
 0x158   :  { %527 = vst.msk [vmem:[#allocation2 + $0x28] sm:$0xff] %vm522_vm5, %v518_v2  ;;  %565 = vperm.xlu2 %1216, %v517_v1   ;;  %1300 = vset.pattern.permute.xlu0 %v1369_v37 }
 0x159   :  { %v441_v54 = vpop.f32.mrf.mxu0  ;;  %v470_v62 = vpop.f32.mrf.mxu1  ;;  %584 = vst.msk [vmem:[#allocation2 + $0x18] sm:$0xff] %vm522_vm5, %v542_v3 }
 0x15a   :  { %v479_v63 = vadd.f32 %v441_v54, %v389_v9  ;;  %v480_v6 = vadd.f32 %v470_v62, %v390_v53 }
 0x15c   :  { %v511_v49 = vadd.f32 %v1509_v5, %v479_v63  ;;  %v512_v7 = vadd.f32 %v1509_v5, %v480_v6  ;;  %v534_v5 = vlaneseq }
 0x15e   :  { %v519_v10 = vmax.f32 %v511_v49, 0.0  ;;  %v520_v11 = vmax.f32 %v512_v7, 0.0  ;;  %v535_v14 = vand.u32 127, %v534_v5 }
 0x15f   :  { %v544_v12 = vld [vmem:[#allocation2 + $0x28] sm:$0xff] }
 0x160   :  { %529 = vst.msk [vmem:[#allocation2 + $0x38] sm:$0xff] %vm522_vm5, %v520_v11  ;;  %570 = vperm.xlu1 %1218, %v519_v10   ;;  %1301 = vset.pattern.permute.xlu2 %v1369_v37  ;;  %v1151_v17 = vadd.s32 4294967292, %v535_v14 }
 0x161   :  { %586 = vst.msk [vmem:[#allocation2 + $0x28] sm:$0xff] %vm522_vm5, %v544_v12 }
 0x162   :  { %vm547_vm6 = vcmp.lt.s32.totalorder %v1151_v17, 0  ;;  %vm609_vm7 = vcmp.eq.s32.totalorder %v1151_v17, 11  ;;  %vm639_vm8 = vcmp.gt.s32.totalorder %v1151_v17, 11 }
 0x167   :  { %v546_v4 = vld [vmem:[#allocation2 + $0x38] sm:$0xff] }
 0x168   :  { %555 = vperm.xlu1 %1218, %v513_v16   ;;  %588 = vst.msk [vmem:[#allocation2 + $0x38] sm:$0xff] %vm522_vm5, %v546_v4 }
 0x170   :  { %1299 = vset.pattern.permute.xlu1 %v1369_v37 }
 0x1b2   :  { %v566_v18 = vpop.permute.xlu2 %565 }
 0x1b3   :  { %v577_v19 = vsel %vm547_vm6, %v566_v18, %v517_v1 }
 0x1b4   :  { %v619_v20 = vsel %vm609_vm7, %v577_v19, 0.0 }
 0x1b5   :  { %633 = vadd.xlane.f32.xlu1 %v619_v20 }
 0x1c2   :  { %v561_v21 = vpop.permute.xlu0 %560 }
 0x1c3   :  { %v575_v13 = vsel %vm547_vm6, %v561_v21, %v515_v39 }
 0x1c4   :  { %v617_v22 = vsel %vm609_vm7, %v575_v13, 0.0 }
 0x1c5   :  { %629 = vadd.xlane.f32.xlu0 %v617_v22 }
 0x1ce   :  { %677 = vrot.lane.b32.xlu1 %v1547_v28, %s1367_s24 }
 0x1d2   :  { %v571_v23 = vpop.permute.xlu1 %570 }
 0x1d3   :  { %v579_v37 = vsel %vm547_vm6, %v571_v23, %v519_v10 }
 0x1d4   :  { %v621_v27 = vsel %vm609_vm7, %v579_v37, 0.0 }
 0x1d9   :  { %679 = vrot.lane.b32.xlu0 %v1554_v29, %s1367_s24 }
 0x1da   :  { %v556_v24 = vpop.permute.xlu1 %555 }
 0x1db   :  { %v573_v25 = vsel %vm547_vm6, %v556_v24, %v513_v16  ;;  %v1017_v16 = vld [vmem:[%s1682_s4 + $0x18] sm:$0xff]  ;;  %v1014_v24 = vld [vmem:[%s1682_s4] sm:$0xff] }
 0x1dc   :  { %v615_v26 = vsel %vm609_vm7, %v573_v25, 0.0 }
 0x1dd   :  { %625 = vadd.xlane.f32.xlu2 %v615_v26 }
 0x1e5   :  { %637 = vadd.xlane.f32.xlu2 %v621_v27 }
 0x228   :  { %v634_v30 = vpop.xlane.xlu1 %633 }
 0x229   :  { %v649_v31 = vsel %vm639_vm8, %v634_v30, %v577_v19  ;;  %658 = vst.msk [vmem:[#allocation2 + $0x28] sm:$0xff] %vm522_vm5, %v634_v30 }
 0x230   :  { %v671_v32 = vld [vmem:[#allocation2 + $0x28] sm:$0xff] }
 0x231   :  { %v1229_v33 = vpack.i.bf16 %v671_v32, %v649_v31 }
 0x233   :  { %1230 = vrot.lane.b32.xlu1 %v1229_v33, %s1366_s23 }
 0x238   :  { %v630_v34 = vpop.xlane.xlu0 %629 }
 0x239   :  { %v647_v36 = vsel %vm639_vm8, %v630_v34, %v575_v13  ;;  %656 = vst.msk [vmem:[#allocation2 + $0x18] sm:$0xff] %vm522_vm5, %v630_v34 }
 0x23b   :  { %683 = vrot.lane.b32.xlu1 %v1564_v35, %s1367_s24 }
 0x240   :  { %v670_v38 = vld [vmem:[#allocation2 + $0x18] sm:$0xff]  ;;  %v678_v51 = vpop.permute.xlu1 %677 }
 0x241   :  { %v1224_v39 = vpack.i.bf16 %v670_v38, %v647_v36 }
 0x243   :  { %1225 = vrot.lane.b32.xlu0 %v1224_v39, %s1366_s23  ;;  %1240 = vrot.lane.b32.xlu1 %v1229_v33, %s1371_s18 }
 0x24b   :  { %1245 = vrot.lane.b32.xlu0 %v1229_v33, %s1372_s19  ;;  %1250 = vrot.lane.b32.xlu1 %v1224_v39, %s1371_s18  ;;  %v680_v52 = vpop.permute.xlu0 %679 }
 0x250   :  { %v626_v40 = vpop.xlane.xlu2 %625 }
 0x251   :  { %v645_v41 = vsel %vm639_vm8, %v626_v40, %v573_v25  ;;  %654 = vst.msk [vmem:[#allocation2 + $0x8] sm:$0xff] %vm522_vm5, %v626_v40 }
 0x253   :  { %1255 = vrot.lane.b32.xlu0 %v1224_v39, %s1372_s19 }
 0x258   :  { %v638_v42 = vpop.xlane.xlu2 %637  ;;  %v669_v43 = vld [vmem:[#allocation2 + $0x8] sm:$0xff] }
 0x259   :  { %v651_v45 = vsel %vm639_vm8, %v638_v42, %v579_v37  ;;  %660 = vst.msk [vmem:[#allocation2 + $0x38] sm:$0xff] %vm522_vm5, %v638_v42  ;;  %v1219_v46 = vpack.i.bf16 %v669_v43, %v645_v41  ;;  %v940_v43 = vld [vmem:[%s1681_s3 + $0x8] sm:$0xff] }
 0x25a   :  { %775 = vmatpush.msra.mxu3 %v651_v45 }
 0x25b   :  { %1220 = vrot.lane.b32.xlu2 %v1219_v46, %s1366_s23  ;;  %1265 = vrot.lane.b32.xlu1 %v1219_v46, %s1371_s18 }
 0x25c   :  { %776 = vmatpush.msra.mxu3 %v649_v31 }
 0x25e   :  { %777 = vmatpush.msra.mxu3 %v647_v36 }
 0x260   :  { %v672_v47 = vld [vmem:[#allocation2 + $0x38] sm:$0xff]  ;;  %778 = vmatpush.msra.mxu3 %v645_v41 }
 0x261   :  { %v1234_v48 = vpack.i.bf16 %v672_v47, %v651_v45  ;;  %1157 = vmatmul.msk.f32.vlgmr.msra.gmra.mxu3 %vm717_vm9, %v1547_v28 }
 0x263   :  { %1235 = vrot.lane.b32.xlu2 %v1234_v48, %s1366_s23  ;;  %1270 = vrot.lane.b32.xlu0 %v1234_v48, %s1371_s18 }
 0x264   :  { %792 = vrot.lane.b32.xlu1 %v1547_v28, %s1373_s1 }
 0x269   :  { %1158 = vmatmul.msk.f32.gmra.mxu3 %vm717_vm9, %v1554_v29 }
 0x26b   :  { %681 = vrot.lane.b32.xlu2 %v663_v50, %s1367_s24  ;;  %1275 = vrot.lane.b32.xlu0 %v1219_v46, %s1372_s19 }
 0x26c   :  { %794 = vrot.lane.b32.xlu1 %v1554_v29, %s1373_s1 }
 0x271   :  { %1159 = vmatmul.msk.f32.gmra.mxu3 %vm717_vm9, %v663_v50 }
 0x273   :  { %1260 = vrot.lane.b32.xlu2 %v1229_v33, %s1374_s22  ;;  %1285 = vrot.lane.b32.xlu0 %v1219_v46, %s1374_s22 }
 0x274   :  { %870 = vrot.lane.b32.xlu1 %v663_v50, %s1375_s0 }
 0x279   :  { %1160 = vmatmul.msk.f32.gmra.mxu3 %vm717_vm9, %v1564_v35 }
 0x27b   :  { %1280 = vrot.lane.b32.xlu2 %v1224_v39, %s1374_s22  ;;  %868 = vrot.lane.b32.xlu0 %v1554_v29, %s1375_s0 }
 0x27c   :  { %1035 = vperm.xlu1 %1299, %v1017_v16  }
 0x283   :  { %1290 = vrot.lane.b32.xlu2 %v1234_v48, %s1372_s19  ;;  %798 = vrot.lane.b32.xlu0 %v1564_v35, %s1373_s1 }
 0x284   :  { %1020 = vperm.xlu1 %1299, %v1014_v24  }
 0x28b   :  { %1295 = vrot.lane.b32.xlu2 %v1234_v48, %s1374_s22 }
 0x293   :  { %866 = vrot.lane.b32.xlu2 %v1547_v28, %s1375_s0 }
 0x29b   :  { %796 = vrot.lane.b32.xlu2 %v663_v50, %s1373_s1  ;;  %s1376_s1 = smov [#allocation6]  }
 0x29c   :  { %s1099_s20 = sshll.u32 %s1376_s1, 4  ;;  %s1100_s20 = int_to_ptr.vmem [resolvable:$true] %s1099_s20 }
 0x2a3   :  { %872 = vrot.lane.b32.xlu2 %v1564_v35, %s1375_s0  ;;  %s1101_s0 = sshll.u32 %s1687_s9, 4  ;;  %s1102_s0 = int_to_ptr.hbm [resolvable:$true] %s1101_s0 }
 0x2a5   :  { %v1231_v55 = vpop.permute.xlu1 %1230 }
 0x2a6   :  { %v1233_v61 = vunpack.i.h.bf16 %v1231_v55  ;;  %v1232_v0 = vunpack.i.l.bf16 %v1231_v55 }
 0x2a8   :  { %v711_v62 = vsel %vm313_vm3, %v1232_v0, %v1233_v61 }
 0x2ad   :  { %v684_v59 = vpop.permute.xlu1 %683 }
 0x2b5   :  { %v1221_v57 = vpop.permute.xlu2 %1220  ;;  %v1226_v58 = vpop.permute.xlu0 %1225 }
 0x2b6   :  { %v1228_v3 = vunpack.i.h.bf16 %v1226_v58  ;;  %v1227_v8 = vunpack.i.l.bf16 %v1226_v58  ;;  %v1223_v53 = vunpack.i.h.bf16 %v1221_v57  ;;  %v1222_v54 = vunpack.i.l.bf16 %v1221_v57  ;;  %v1241_v44 = vpop.permute.xlu1 %1240  ;;  %v1016_v57 = vld [vmem:[%s1682_s4 + $0x10] sm:$0xff]  ;;  %v1078_v58 = vld [vmem:[%s1685_s7] sm:$0xff] }
 0x2b7   :  { %v1243_v4 = vunpack.i.h.bf16 %v1241_v44  ;;  %v1242_v5 = vunpack.i.l.bf16 %v1241_v44  ;;  %1030 = vperm.xlu0 %1300, %v1016_v57   ;;  %1081 = vperm.xlu1 %1299, %v1078_v58  }
 0x2b8   :  { %v710_v6 = vsel %vm313_vm3, %v1227_v8, %v1228_v3  ;;  %v709_v7 = vsel %vm313_vm3, %v1222_v54, %v1223_v53  ;;  %v1077_v53 = vld [vmem:[%s1686_s8] sm:$0xff] }
 0x2b9   :  { %v963_v23 = vsel %vm960_vm10, %v1242_v5, %v1243_v4  ;;  %v1047_v54 = vld [vmem:[%s1684_s6] sm:$0xff] }
 0x2bd   :  { %v1236_v60 = vpop.permute.xlu2 %1235  ;;  %v1246_v63 = vpop.permute.xlu0 %1245 }
 0x2be   :  { %v1238_v1 = vunpack.i.h.bf16 %v1236_v60  ;;  %v1237_v2 = vunpack.i.l.bf16 %v1236_v60  ;;  %v1251_v11 = vpop.permute.xlu1 %1250  ;;  %v1248_v26 = vunpack.i.h.bf16 %v1246_v63  ;;  %v1247_v28 = vunpack.i.l.bf16 %v1246_v63 }
 0x2bf   :  { %v1253_v19 = vunpack.i.h.bf16 %v1251_v11  ;;  %v1252_v20 = vunpack.i.l.bf16 %v1251_v11  ;;  %1089 = vperm.xlu0 %1300, %v1077_v53  }
 0x2c0   :  { %v712_v9 = vsel %vm313_vm3, %v1237_v2, %v1238_v1  ;;  %v819_v38 = vsel %vm816_vm11, %v1247_v28, %v1248_v26 }
 0x2c1   :  { %738 = vmatpush.msra.mxu2 %v712_v9  ;;  %v962_v25 = vsel %vm960_vm10, %v1252_v20, %v1253_v19  ;;  %v941_v9 = vld [vmem:[%s1681_s3 + $0x18] sm:$0xff] }
 0x2c3   :  { %739 = vmatpush.msra.mxu2 %v711_v62 }
 0x2c5   :  { %v682_v49 = vpop.permute.xlu2 %681  ;;  %740 = vmatpush.msra.mxu2 %v710_v6  ;;  %v1256_v56 = vpop.permute.xlu0 %1255  ;;  %v942_v6 = vld [vmem:[%s1681_s3 + $0x28] sm:$0xff] }
 0x2c6   :  { %v1258_v32 = vunpack.i.h.bf16 %v1256_v56  ;;  %v1257_v33 = vunpack.i.l.bf16 %v1256_v56 }
 0x2c7   :  { %741 = vmatpush.msra.mxu2 %v709_v7  ;;  %v943_v7 = vld [vmem:[%s1681_s3 + $0x38] sm:$0xff] }
 0x2c8   :  { %1153 = vmatmul.msk.f32.vlgmr.msra.gmra.mxu2 %vm717_vm9, %v678_v51  ;;  %v818_v40 = vsel %vm816_vm11, %v1257_v33, %v1258_v32 }
 0x2cd   :  { %v1603_v10 = vpop.permute.xlu2 %1260  ;;  %v1266_v18 = vpop.permute.xlu1 %1265 }
 0x2ce   :  { %v1268_v13 = vunpack.i.h.bf16 %v1266_v18  ;;  %v1267_v22 = vunpack.i.l.bf16 %v1266_v18  ;;  %v1263_v41 = vunpack.i.h.bf16 %v1603_v10  ;;  %v1262_v45 = vunpack.i.l.bf16 %v1603_v10 }
 0x2d0   :  { %1154 = vmatmul.msk.f32.gmra.mxu2 %vm717_vm9, %v680_v52  ;;  %v961_v31 = vsel %vm960_vm10, %v1267_v22, %v1268_v13  ;;  %v893_v0 = vsel %vm890_vm12, %v1262_v45, %v1263_v41 }
 0x2d5   :  { %v1606_v12 = vpop.permute.xlu2 %1280  ;;  %v1271_v15 = vpop.permute.xlu0 %1270 }
 0x2d6   :  { %v1273_v14 = vunpack.i.h.bf16 %v1271_v15  ;;  %v1272_v17 = vunpack.i.l.bf16 %v1271_v15  ;;  %v793_v39 = vpop.permute.xlu1 %792  ;;  %v1283_v51 = vunpack.i.h.bf16 %v1606_v12  ;;  %v1282_v52 = vunpack.i.l.bf16 %v1606_v12 }
 0x2d8   :  { %1155 = vmatmul.msk.f32.gmra.mxu2 %vm717_vm9, %v682_v49  ;;  %v964_v21 = vsel %vm960_vm10, %v1272_v17, %v1273_v14  ;;  %v892_v1 = vsel %vm890_vm12, %v1282_v52, %v1283_v51 }
 0x2d9   :  { %993 = vmatpush.msrb.mxu2 %v964_v21 }
 0x2db   :  { %994 = vmatpush.msrb.mxu2 %v963_v23 }
 0x2dd   :  { %v1291_v37 = vpop.permute.xlu2 %1290  ;;  %v1276_v27 = vpop.permute.xlu0 %1275  ;;  %995 = vmatpush.msrb.mxu2 %v962_v25 }
 0x2de   :  { %v1293_v29 = vunpack.i.h.bf16 %v1291_v37  ;;  %v1292_v30 = vunpack.i.l.bf16 %v1291_v37  ;;  %v1278_v35 = vunpack.i.h.bf16 %v1276_v27  ;;  %v1277_v36 = vunpack.i.l.bf16 %v1276_v27  ;;  %v795_v3 = vpop.permute.xlu1 %794 }
 0x2df   :  { %996 = vmatpush.msrb.mxu2 %v961_v31 }
 0x2e0   :  { %1156 = vmatmul.msk.f32.gmra.mxu2 %vm717_vm9, %v684_v59  ;;  %v820_v34 = vsel %vm816_vm11, %v1292_v30, %v1293_v29  ;;  %v817_v48 = vsel %vm816_vm11, %v1277_v36, %v1278_v35  ;;  %v1015_v59 = vld [vmem:[%s1682_s4 + $0x8] sm:$0xff] }
 0x2e1   :  { %845 = vmatpush.msrb.mxu0 %v820_v34  ;;  %1025 = vperm.xlu2 %1301, %v1015_v59  }
 0x2e3   :  { %846 = vmatpush.msrb.mxu0 %v819_v38 }
 0x2e4   :  { %v780_v15 = vpop.f32.mrf.mxu3 }
 0x2e5   :  { %v1296_v42 = vpop.permute.xlu2 %1295  ;;  %847 = vmatpush.msrb.mxu0 %v818_v40  ;;  %v1286_v50 = vpop.permute.xlu0 %1285 }
 0x2e6   :  { %v1298_v46 = vunpack.i.h.bf16 %v1296_v42  ;;  %v1297_v47 = vunpack.i.l.bf16 %v1296_v42  ;;  %v1288_v60 = vunpack.i.h.bf16 %v1286_v50  ;;  %v1287_v61 = vunpack.i.l.bf16 %v1286_v50  ;;  %v871_v49 = vpop.permute.xlu1 %870 }
 0x2e7   :  { %848 = vmatpush.msrb.mxu0 %v817_v48 }
 0x2e8   :  { %1161 = vmatmul.msk.f32.vlgmr.msrb.gmra.mxu0 %vm717_vm9, %v793_v39  ;;  %v894_v55 = vsel %vm890_vm12, %v1297_v47, %v1298_v46  ;;  %1169 = vmatmul.msk.f32.vlgmr.msrb.gmra.mxu2 %vm717_vm9, %v940_v43  ;;  %v891_v8 = vsel %vm890_vm12, %v1287_v61, %v1288_v60  ;;  %v1046_v61 = vld [vmem:[%s1683_s5] sm:$0xff] }
 0x2e9   :  { %919 = vmatpush.msrb.mxu1 %v894_v55  ;;  %1050 = vperm.xlu2 %1301, %v1047_v54  }
 0x2eb   :  { %920 = vmatpush.msrb.mxu1 %v893_v0 }
 0x2ec   :  { %v783_v5 = vpop.f32.mrf.mxu3 }
 0x2ed   :  { %921 = vmatpush.msrb.mxu1 %v892_v1  ;;  %v867_v2 = vpop.permute.xlu2 %866  ;;  %v869_v62 = vpop.permute.xlu0 %868 }
 0x2ee   :  { %v1036_v27 = vpop.permute.xlu1 %1035 }
 0x2ef   :  { %922 = vmatpush.msrb.mxu1 %v891_v8 }
 0x2f0   :  { %1162 = vmatmul.msk.f32.gmra.mxu0 %vm717_vm9, %v795_v3  ;;  %1165 = vmatmul.msk.f32.vlgmr.msrb.gmra.mxu1 %vm717_vm9, %v867_v2 }
 0x2f1   :  { %1170 = vmatmul.msk.f32.gmra.mxu2 %vm717_vm9, %v941_v9 }
 0x2f4   :  { %v786_v20 = vpop.f32.mrf.mxu3 }
 0x2f5   :  { %v797_v63 = vpop.permute.xlu2 %796  ;;  %v799_v44 = vpop.permute.xlu0 %798 }
 0x2f6   :  { %v1021_v51 = vpop.permute.xlu1 %1020 }
 0x2f8   :  { %1163 = vmatmul.msk.f32.gmra.mxu0 %vm717_vm9, %v797_v63  ;;  %1166 = vmatmul.msk.f32.gmra.mxu1 %vm717_vm9, %v869_v62 }
 0x2f9   :  { %1171 = vmatmul.msk.f32.gmra.mxu2 %vm717_vm9, %v942_v6 }
 0x2fc   :  { %v789_v25 = vpop.f32.mrf.mxu3 }
 0x2fd   :  { %v873_v56 = vpop.permute.xlu2 %872 }
 0x300   :  { %1164 = vmatmul.msk.f32.gmra.mxu0 %vm717_vm9, %v799_v44  ;;  %1167 = vmatmul.msk.f32.gmra.mxu1 %vm717_vm9, %v871_v49 }
 0x301   :  { %1172 = vmatmul.msk.f32.gmra.mxu2 %vm717_vm9, %v943_v7 }
 0x308   :  { %1168 = vmatmul.msk.f32.gmra.mxu1 %vm717_vm9, %v873_v56 }
 0x329   :  { %v1031_v42 = vpop.permute.xlu0 %1030  ;;  %v1082_v8 = vpop.permute.xlu1 %1081 }
 0x331   :  { %v1090_v62 = vpop.permute.xlu0 %1089 }
 0x33b   :  { %v1026_v46 = vpop.permute.xlu2 %1025 }
 0x343   :  { %v1051_v0 = vpop.permute.xlu2 %1050 }
 0x34b   :  { %v743_v10 = vpop.f32.mrf.mxu2 }
 0x34c   :  { %v781_v29 = vadd.f32 %v780_v15, %v743_v10 }
 0x353   :  { %v746_v11 = vpop.f32.mrf.mxu2 }
 0x354   :  { %v784_v26 = vadd.f32 %v783_v5, %v746_v11 }
 0x35b   :  { %v749_v12 = vpop.f32.mrf.mxu2 }
 0x35c   :  { %v787_v24 = vadd.f32 %v786_v20, %v749_v12 }
 0x363   :  { %v752_v16 = vpop.f32.mrf.mxu2 }
 0x364   :  { %v790_v30 = vadd.f32 %v789_v25, %v752_v16 }
 0x365   :  { %v850_v4 = vpop.f32.mrf.mxu0 }
 0x366   :  { %v862_v33 = vadd.f32 %v850_v4, %v781_v29 }
 0x36b   :  { %v998_v14 = vpop.f32.mrf.mxu2 }
 0x36d   :  { %v853_v17 = vpop.f32.mrf.mxu0  ;;  %v924_v18 = vpop.f32.mrf.mxu1 }
 0x36e   :  { %v863_v31 = vadd.f32 %v853_v17, %v784_v26  ;;  %v936_v39 = vadd.f32 %v924_v18, %v862_v33 }
 0x370   :  { %v1010_v47 = vadd.f32 %v998_v14, %v936_v39 }
 0x372   :  { %v1038_v57 = vadd.f32 %v1021_v51, %v1010_v47 }
 0x374   :  { %v1001_v19 = vpop.f32.mrf.mxu2  ;;  %v1042_v60 = vmax.f32 %v1038_v57, 0.0 }
 0x375   :  { %v927_v21 = vpop.f32.mrf.mxu1  ;;  %v856_v13 = vpop.f32.mrf.mxu0 }
 0x376   :  { %v864_v37 = vadd.f32 %v856_v13, %v787_v24  ;;  %v937_v34 = vadd.f32 %v927_v21, %v863_v31 }
 0x378   :  { %v1011_v43 = vadd.f32 %v1001_v19, %v937_v34 }
 0x37a   :  { %v1039_v52 = vadd.f32 %v1026_v46, %v1011_v43 }
 0x37c   :  { %v1004_v22 = vpop.f32.mrf.mxu2  ;;  %v1043_v59 = vmax.f32 %v1039_v52, 0.0 }
 0x37d   :  { %v930_v23 = vpop.f32.mrf.mxu1  ;;  %v859_v28 = vpop.f32.mrf.mxu0 }
 0x37e   :  { %v938_v32 = vadd.f32 %v930_v23, %v864_v37  ;;  %v865_v35 = vadd.f32 %v859_v28, %v790_v30 }
 0x380   :  { %v1012_v40 = vadd.f32 %v1004_v22, %v938_v32 }
 0x382   :  { %v1040_v48 = vadd.f32 %v1031_v42, %v1012_v40 }
 0x384   :  { %v1007_v38 = vpop.f32.mrf.mxu2  ;;  %v1044_v58 = vmax.f32 %v1040_v48, 0.0 }
 0x385   :  { %v933_v36 = vpop.f32.mrf.mxu1 }
 0x386   :  { %v939_v41 = vadd.f32 %v933_v36, %v865_v35 }
 0x388   :  { %v1013_v45 = vadd.f32 %v1007_v38, %v939_v41 }
 0x38a   :  { %v1041_v50 = vadd.f32 %v1036_v27, %v1013_v45 }
 0x38c   :  { %v1045_v55 = vmax.f32 %v1041_v50, 0.0 }
 0x38e   :  { %1068 = vmatpush.msrb.mxu3 %v1045_v55 }
 0x390   :  { %1069 = vmatpush.msrb.mxu3 %v1044_v58 }
 0x392   :  { %1070 = vmatpush.msrb.mxu3 %v1043_v59 }
 0x394   :  { %1071 = vmatpush.msrb.mxu3 %v1042_v60 }
 0x395   :  { %1173 = vmatmul.msk.f32.vlgmr.msrb.gmra.mxu3 %vm717_vm9, %v1046_v61 }
 0x418   :  { %v1073_v1 = vpop.f32.mrf.mxu3 }
 0x419   :  { %v1074_v2 = vadd.f32 %v1073_v1, %v1051_v0 }
 0x41b   :  { %1302 = vtanh.f32 %v1074_v2 }
 0x421   :  { %v1303_v3 = vpop.eup %1302 }
 0x422   :  { %v1084_v9 = vmul.f32 %v1303_v3, %v1082_v8 }
 0x424   :  { %v1085_v53 = vmul.f32 1.442695, %v1084_v9 }
 0x426   :  { %1304 = vpow2.f32 %v1085_v53 }
 0x42c   :  { %v1305_v54 = vpop.eup %1304 }
 0x42d   :  { %v1092_v63 = vmul.f32 %v1305_v54, %v1090_v62 }
 0x42f   :  { %1093 = vst [vmem:[#allocation6] sm:$0xff] %v1092_v63 }
 0x430   :  { %1104 = dma.vmem_to_hbm [thread:$0]  %s1100_s20, 128, %s1102_s0, [#allocation5]  }
 0x431   :  { %1356 = dma.done.wait [#allocation5], 128  }
 0x432   :  { %1357 = vsyncadd [#allocation5], 4294967168 }
 0x433   :  { %1109 = vsyncpa [#allocation4], 1 }
 0x434   :  { %1110 = vsyncpa [#allocation5], 1 }

</bundles_post_ra>
